<compile_context>
chip_gen: v6e
topology: v6e:2x2x1
jax: 0.10.0
libtpu: 0.0.40
codegen_flags: <defaults>
</compile_context>

<pallas_src>
import numpy as np
import jax
import jax.numpy as jnp
from jax.experimental import pallas as pl
from jax.experimental.pallas import tpu as pltpu

EPS = 1e-5                       # nn.BatchNorm2d default eps
MATMUL_DTYPE = jnp.bfloat16      # bf16 operands, f32 accumulation (v5e/v6e/v7x MXU)
VMEM_LIMIT = 32 * 1024 * 1024    # scoped VMEM limit (safe on v5e/v6e/v7x)
VMEM_BUDGET = 16 * 1024 * 1024   # tile-sizing budget (headroom under the limit)


# --------------------------------------------------------------------------- #
# Kernels
# --------------------------------------------------------------------------- #
def _conv_stats_kernel(w_ref, b_ref, p_ref, z_ref, stats_ref):
    """One im2col'd conv tile + fused BN partial statistics.

    w_ref:     (Cout, K)      bf16   (K = 9*Cin, taps folded into contraction)
    b_ref:     (Cout, 1)      f32
    p_ref:     (K, TM)        bf16   im2col patches, pixels on the lane axis
    z_ref:     (Cout, TM)     f32    raw conv output (lane-dense store)
    stats_ref: (1, Cout, 2)   f32    per-tile [sum, sum_of_squares]
    """
    acc = jnp.dot(w_ref[...], p_ref[...], preferred_element_type=jnp.float32)
    acc = acc + b_ref[...]
    z_ref[...] = acc
    stats_ref[0, :, 0:1] = jnp.sum(acc, axis=1, keepdims=True)
    stats_ref[0, :, 1:2] = jnp.sum(acc * acc, axis=1, keepdims=True)


def _bn_relu_kernel(scale_ref, shift_ref, z_ref, y_ref):
    """Folded BatchNorm affine + ReLU:  y = max(z*scale + shift, 0)."""
    y = jnp.maximum(z_ref[...] * scale_ref[...] + shift_ref[...], 0.0)
    y_ref[...] = y.astype(y_ref.dtype)


def _bilerp_kernel(w_ref, g00_ref, g01_ref, g10_ref, g11_ref, o_ref):
    """Bilinear blend of the 4 gathered corner planes (exact f32, VPU only)."""
    o_ref[...] = (g00_ref[...] * w_ref[0:1, :] + g01_ref[...] * w_ref[1:2, :]
                  + g10_ref[...] * w_ref[2:3, :] + g11_ref[...] * w_ref[3:4, :])


# --------------------------------------------------------------------------- #
# Host-side helpers (layout plumbing only)
# --------------------------------------------------------------------------- #
def _divisor_tile(total, unit, max_units):
    """Largest multiple of `unit` dividing `total` that is <= max_units.

    Falls back to `total` (full extent, which is always a legal block shape)."""
    max_units = max(unit, min(total, max_units))
    best = None
    d = unit
    while d <= max_units:
        if total % d == 0:
            best = d
        d += unit
    return best if best is not None else total


def _interp_1d(n_in, n_out):
    """align_corners=True bilinear sample positions (lo, hi, frac) as numpy."""
    if n_in == 1 or n_out == 1:
        z = np.zeros(n_out, np.int32)
        return z, z.copy(), np.zeros(n_out, np.float32)
    src = np.arange(n_out, dtype=np.float64) * (n_in - 1) / (n_out - 1)
    lo = np.clip(np.floor(src).astype(np.int32), 0, n_in - 1)
    hi = np.minimum(lo + 1, n_in - 1)
    frac = (src - lo).astype(np.float32)
    return lo, hi, frac


def _bilinear_upsample_2x_cm(x):
    """x: (N, C, H, W) f32 -> (C, N, 2H, 2W) f32 channel-major (align_corners=True)."""
    N, C, H, W = x.shape
    Ho, Wo = 2 * H, 2 * W
    ylo, yhi, fy = _interp_1d(H, Ho)
    xlo, xhi, fx = _interp_1d(W, Wo)

    # corner gathers = pure data movement (wrapper); arithmetic stays in Pallas.
    x_cm = jnp.transpose(x, (1, 0, 2, 3))
    g00 = x_cm[:, :, ylo][:, :, :, xlo]
    g01 = x_cm[:, :, ylo][:, :, :, xhi]
    g10 = x_cm[:, :, yhi][:, :, :, xlo]
    g11 = x_cm[:, :, yhi][:, :, :, xhi]

    R, L = C * N, Ho * Wo
    g00, g01, g10, g11 = (g.reshape(R, L) for g in (g00, g01, g10, g11))

    w00 = (1.0 - fy)[:, None] * (1.0 - fx)[None, :]
    w01 = (1.0 - fy)[:, None] * fx[None, :]
    w10 = fy[:, None] * (1.0 - fx)[None, :]
    w11 = fy[:, None] * fx[None, :]
    wplanes = jnp.asarray(
        np.stack([w00, w01, w10, w11], axis=0).reshape(4, L), jnp.float32)

    # 2-D tiling: pixels on lanes, rows on sublanes, both sized against VMEM.
    TL = _divisor_tile(L, 128, 8192)
    per_row = 10 * TL * 4            # 4 inputs + 1 output, f32, double-buffered
    TR = _divisor_tile(R, 8, max(8, min(1024, VMEM_BUDGET // per_row)))
    row_spec = pl.BlockSpec((TR, TL), lambda i, j: (i, j))

    out = pl.pallas_call(
        _bilerp_kernel,
        out_shape=jax.ShapeDtypeStruct((R, L), jnp.float32),
        grid=(R // TR, L // TL),
        in_specs=[pl.BlockSpec((4, TL), lambda i, j: (0, j)),
                  row_spec, row_spec, row_spec, row_spec],
        out_specs=row_spec,
        compiler_params=pltpu.CompilerParams(
            dimension_semantics=("parallel", "parallel"),
            vmem_limit_bytes=VMEM_LIMIT),
    )(wplanes, g00, g01, g10, g11)
    return out.reshape(C, N, Ho, Wo)


def _w_to_mat(w):
    """(Cout, Cin, 3, 3) -> (Cout, 9*Cin), K index = (ky*3+kx)*Cin + cin."""
    return jnp.transpose(w, (0, 2, 3, 1)).reshape(w.shape[0], -1)


def _conv_bn_relu_stage(x_cm_pad, w_mat, b_col, gamma, beta, out_dtype):
    """Conv3x3(pad=1) -> BatchNorm(batch stats) -> ReLU, channel-major.

    x_cm_pad: (Cin, N, H+2, W+2) zero-padded input.
    w_mat:    (Cout, 9*Cin), b_col: (Cout, 1), gamma/beta: (Cout,)
    Returns:  (Cout, N*H*W) in `out_dtype`.
    """
    Cin, N, Hp, Wp = x_cm_pad.shape
    H, W = Hp - 2, Wp - 2
    M = N * H * W
    Cout = w_mat.shape[0]
    K = 9 * Cin

    # im2col in the wrapper (layout plumbing): K index = (dy*3+dx)*Cin + c.
    patches = jnp.concatenate(
        [x_cm_pad[:, :, dy:dy + H, dx:dx + W]
         for dy in range(3) for dx in range(3)],
        axis=0).reshape(K, M).astype(MATMUL_DTYPE)
    w_mat = w_mat.astype(MATMUL_DTYPE)

    # VMEM-aware tile: double-buffered (K,TM) bf16 patch + (Cout,TM) f32 output
    # tiles plus the resident weight block must fit the budget.
    fixed = 2 * Cout * K * 2 + 4 * Cout * 4
    per_m = 2 * K * 2 + 2 * Cout * 4
    TM = _divisor_tile(M, 128,
                       min(8192, max(128, (VMEM_BUDGET - fixed) // per_m)))
    G = M // TM
    cparams = pltpu.CompilerParams(dimension_semantics=("parallel",),
                                   vmem_limit_bytes=VMEM_LIMIT)

    z, stats = pl.pallas_call(
        _conv_stats_kernel,
        out_shape=(jax.ShapeDtypeStruct((Cout, M), jnp.float32),
                   jax.ShapeDtypeStruct((G, Cout, 2), jnp.float32)),
        grid=(G,),
        in_specs=[pl.BlockSpec((Cout, K), lambda i: (0, 0)),
                  pl.BlockSpec((Cout, 1), lambda i: (0, 0)),
                  pl.BlockSpec((K, TM), lambda i: (0, i))],
        out_specs=(pl.BlockSpec((Cout, TM), lambda i: (0, i)),
                   pl.BlockSpec((1, Cout, 2), lambda i: (i, 0, 0))),
        compiler_params=cparams,
    )(w_mat, b_col.astype(jnp.float32), patches)

    # BN finalization: O(Cout) math, single-pass variance, folded scale/shift.
    tot = jnp.sum(stats, axis=0)                       # (Cout, 2)
    mean = tot[:, 0] / M
    var = jnp.maximum(tot[:, 1] / M - mean * mean, 0.0)
    inv = jax.lax.rsqrt(var + EPS)
    scale = (gamma * inv).reshape(Cout, 1).astype(jnp.float32)
    shift = (beta - mean * gamma * inv).reshape(Cout, 1).astype(jnp.float32)

    y = pl.pallas_call(
        _bn_relu_kernel,
        out_shape=jax.ShapeDtypeStruct((Cout, M), out_dtype),
        grid=(G,),
        in_specs=[pl.BlockSpec((Cout, 1), lambda i: (0, 0)),
                  pl.BlockSpec((Cout, 1), lambda i: (0, 0)),
                  pl.BlockSpec((Cout, TM), lambda i: (0, i))],
        out_specs=pl.BlockSpec((Cout, TM), lambda i: (0, i)),
        compiler_params=cparams,
    )(scale, shift, z)
    return y


def up_forward(x1, x2, params):
    """Up.forward (bilinear=True): upsample x1 2x, pad to x2, cat, DoubleConv."""
    w1, b1, g1, be1, w2, b2, g2, be2 = params
    N, C1, H1, W1 = x1.shape
    _, C2, H2, W2 = x2.shape
    Cout = w1.shape[0]

    # bilinear 2x upsample, produced directly channel-major
    x1u = _bilinear_upsample_2x_cm(x1.astype(jnp.float32))   # (C1, N, 2H1, 2W1)
    dy = H2 - x1u.shape[2]
    dx = W2 - x1u.shape[3]
    # merge "pad to skip size" with the first conv's halo pad (single jnp.pad)
    x1u_pad = jnp.pad(x1u, ((0, 0), (0, 0),
                            (1 + dy // 2, 1 + dy - dy // 2),
                            (1 + dx // 2, 1 + dx - dx // 2)))
    x2_pad = jnp.pad(jnp.transpose(x2.astype(jnp.float32), (1, 0, 2, 3)),
                     ((0, 0), (0, 0), (1, 1), (1, 1)))
    # torch.cat([x2, x1], dim=1) -> channel-major concat along axis 0
    x_cm_pad = jnp.concatenate([x2_pad, x1u_pad], axis=0)    # (C2+C1, N, H2+2, W2+2)

    # DoubleConv stage 1
    y1 = _conv_bn_relu_stage(x_cm_pad, _w_to_mat(w1), b1.reshape(-1, 1), g1, be1,
                             out_dtype=MATMUL_DTYPE)         # (Cout, N*H2*W2) bf16

    # stage 2 (intermediate kept bf16 -> halves HBM/im2col traffic)
    y1_cm = jnp.pad(y1.reshape(Cout, N, H2, W2),
                    ((0, 0), (0, 0), (1, 1), (1, 1)))
    y2 = _conv_bn_relu_stage(y1_cm, _w_to_mat(w2), b2.reshape(-1, 1), g2, be2,
                             out_dtype=jnp.float32)          # (Cout, N*H2*W2) f32

    return jnp.transpose(y2.reshape(Cout, N, H2, W2), (1, 0, 2, 3))


# --------------------------------------------------------------------------- #
# Pure-JAX reference (independent) and test harness
# --------------------------------------------------------------------------- #
def _reference(x1, x2, params):
    w1, b1, g1, be1, w2, b2, g2, be2 = params
    N, C1, H1, W1 = x1.shape
    _, C2, H2, W2 = x2.shape

    Ho, Wo = 2 * H1, 2 * W1
    ylo, yhi, fy = _interp_1d(H1, Ho)
    xlo, xhi, fx = _interp_1d(W1, Wo)
    fyj = jnp.asarray(fy)[None, None, :, None]
    fxj = jnp.asarray(fx)[None, None, None, :]
    top = x1[:, :, ylo, :] * (1.0 - fyj) + x1[:, :, yhi, :] * fyj
    up = top[:, :, :, xlo] * (1.0 - fxj) + top[:, :, :, xhi] * fxj
    dy, dx = H2 - Ho, W2 - Wo
    up = jnp.pad(up, ((0, 0), (0, 0),
                      (dy // 2, dy - dy // 2), (dx // 2, dx - dx // 2)))
    x = jnp.concatenate([x2, up], axis=1)

    q = lambda a: a.astype(jnp.bfloat16).astype(jnp.float32)  # match bf16 operands

    def stage(xs, w, b, gamma, beta):
        z = jax.lax.conv_general_dilated(
            q(xs), q(w), (1, 1), ((1, 1), (1, 1)),
            dimension_numbers=('NCHW', 'OIHW', 'NCHW'),
            precision=jax.lax.Precision.HIGHEST)
        z = z + b[None, :, None, None]
        mean = jnp.mean(z, axis=(0, 2, 3), keepdims=True)
        var = jnp.mean((z - mean) ** 2, axis=(0, 2, 3), keepdims=True)
        y = (z - mean) * jax.lax.rsqrt(var + EPS)
        y = y * gamma[None, :, None, None] + beta[None, :, None, None]
        return jnp.maximum(y, 0.0)

    return stage(stage(x, w1, b1, g1, be1), w2, b2, g2, be2)


def _init_params(key, in_channels, out_channels):
    ks = jax.random.split(key, 8)
    k1 = 1.0 / float(np.sqrt(in_channels * 9.0))
    k2 = 1.0 / float(np.sqrt(out_channels * 9.0))
    w1 = jax.random.uniform(ks[0], (out_channels, in_channels, 3, 3),
                            jnp.float32, -k1, k1)
    b1 = jax.random.uniform(ks[1], (out_channels,), jnp.float32, -k1, k1)
    w2 = jax.random.uniform(ks[2], (out_channels, out_channels, 3, 3),
                            jnp.float32, -k2, k2)
    b2 = jax.random.uniform(ks[3], (out_channels,), jnp.float32, -k2, k2)
    g1 = 1.0 + 0.1 * jax.random.normal(ks[4], (out_channels,), jnp.float32)
    be1 = 0.1 * jax.random.normal(ks[5], (out_channels,), jnp.float32)
    g2 = 1.0 + 0.1 * jax.random.normal(ks[6], (out_channels,), jnp.float32)
    be2 = 0.1 * jax.random.normal(ks[7], (out_channels,), jnp.float32)
    return (w1, b1, g1, be1, w2, b2, g2, be2)


if __name__ == "__main__":
    N = 2
    C1 = 4            # channels of x1 (decoder feature, gets upsampled 2x)
    C2 = 4            # channels of x2 (skip connection)
    H1 = W1 = 8       # x1 spatial; x2 is 16x16
    in_channels = C1 + C2
    out_channels = 8

    key = jax.random.PRNGKey(0)
    kx1, kx2, kp = jax.random.split(key, 3)
    x1 = jax.random.normal(kx1, (N, C1, H1, W1), jnp.float32)
    x2 = jax.random.normal(kx2, (N, C2, 2 * H1, 2 * W1), jnp.float32)
    params = _init_params(kp, in_channels, out_channels)

    out = jax.block_until_ready(jax.jit(up_forward)(x1, x2, params))
    ref = jax.block_until_ready(jax.jit(_reference)(x1, x2, params))

    assert out.shape == (N, out_channels, 2 * H1, 2 * W1), out.shape
    max_err = float(jnp.max(jnp.abs(out - ref)))
    assert jnp.allclose(out, ref, atol=5e-3, rtol=5e-3), max_err
    print("KERNEL_OK")
</pallas_src>

<mosaic_0001>
module attributes {stable_mosaic.version = 11 : i64} {
  func.func @_bilerp_kernel(%arg0: i32, %arg1: i32, %arg2: memref<4x256xf32, #tpu.memory_space<vmem>>, %arg3: memref<8x256xf32, #tpu.memory_space<vmem>>, %arg4: memref<8x256xf32, #tpu.memory_space<vmem>>, %arg5: memref<8x256xf32, #tpu.memory_space<vmem>>, %arg6: memref<8x256xf32, #tpu.memory_space<vmem>>, %arg7: memref<8x256xf32, #tpu.memory_space<vmem>>) attributes {dimension_semantics = [#tpu.dimension_semantics<parallel>, #tpu.dimension_semantics<parallel>], iteration_bounds = array<i64: 1, 1>, scalar_prefetch = 0 : i64, scratch_operands = 0 : i64, tpu.core_type = #tpu.core_type<tc>, window_params = [{transform_indices = @transform_0, window_bounds = array<i64: 4, 256>}, {transform_indices = @transform_1, window_bounds = array<i64: 8, 256>}, {transform_indices = @transform_2, window_bounds = array<i64: 8, 256>}, {transform_indices = @transform_3, window_bounds = array<i64: 8, 256>}, {transform_indices = @transform_4, window_bounds = array<i64: 8, 256>}, {transform_indices = @transform_5, window_bounds = array<i64: 8, 256>}]} {
    %c0 = arith.constant 0 : index
    %c0_0 = arith.constant 0 : index
    %0 = vector.load %arg3[%c0, %c0_0] : memref<8x256xf32, #tpu.memory_space<vmem>>, vector<8x256xf32>
    %c0_1 = arith.constant 0 : index
    %c0_2 = arith.constant 0 : index
    %1 = vector.load %arg2[%c0_1, %c0_2] : memref<4x256xf32, #tpu.memory_space<vmem>>, vector<1x256xf32>
    %2 = vector.broadcast %1 : vector<1x256xf32> to vector<8x256xf32>
    %3 = arith.mulf %0, %2 : vector<8x256xf32>
    %c0_3 = arith.constant 0 : index
    %c0_4 = arith.constant 0 : index
    %4 = vector.load %arg4[%c0_3, %c0_4] : memref<8x256xf32, #tpu.memory_space<vmem>>, vector<8x256xf32>
    %c1 = arith.constant 1 : index
    %c0_5 = arith.constant 0 : index
    %5 = vector.load %arg2[%c1, %c0_5] : memref<4x256xf32, #tpu.memory_space<vmem>>, vector<1x256xf32>
    %6 = vector.broadcast %5 : vector<1x256xf32> to vector<8x256xf32>
    %7 = arith.mulf %4, %6 : vector<8x256xf32>
    %8 = arith.addf %3, %7 : vector<8x256xf32>
    %c0_6 = arith.constant 0 : index
    %c0_7 = arith.constant 0 : index
    %9 = vector.load %arg5[%c0_6, %c0_7] : memref<8x256xf32, #tpu.memory_space<vmem>>, vector<8x256xf32>
    %c2 = arith.constant 2 : index
    %c0_8 = arith.constant 0 : index
    %10 = vector.load %arg2[%c2, %c0_8] : memref<4x256xf32, #tpu.memory_space<vmem>>, vector<1x256xf32>
    %11 = vector.broadcast %10 : vector<1x256xf32> to vector<8x256xf32>
    %12 = arith.mulf %9, %11 : vector<8x256xf32>
    %13 = arith.addf %8, %12 : vector<8x256xf32>
    %c0_9 = arith.constant 0 : index
    %c0_10 = arith.constant 0 : index
    %14 = vector.load %arg6[%c0_9, %c0_10] : memref<8x256xf32, #tpu.memory_space<vmem>>, vector<8x256xf32>
    %c3 = arith.constant 3 : index
    %c0_11 = arith.constant 0 : index
    %15 = vector.load %arg2[%c3, %c0_11] : memref<4x256xf32, #tpu.memory_space<vmem>>, vector<1x256xf32>
    %16 = vector.broadcast %15 : vector<1x256xf32> to vector<8x256xf32>
    %17 = arith.mulf %14, %16 : vector<8x256xf32>
    %18 = arith.addf %13, %17 : vector<8x256xf32>
    %c0_12 = arith.constant 0 : index
    %c0_13 = arith.constant 0 : index
    %19 = vector.load %arg7[%c0_12, %c0_13] : memref<8x256xf32, #tpu.memory_space<vmem>>, vector<8x256xf32>
    tpu.vector_store %arg7[%c0_12, %c0_13], %18 {strides = array<i32>} : memref<8x256xf32, #tpu.memory_space<vmem>>, vector<8x256xf32>,
    return
  }
  func.func @transform_0(%arg0: i32, %arg1: i32) -> (i32, i32) {
    %c0_i32 = arith.constant 0 : i32
    %c0_i32_0 = arith.constant 0 : i32
    return %c0_i32, %arg1 : i32, i32
  }
  func.func @transform_1(%arg0: i32, %arg1: i32) -> (i32, i32) {
    %c0_i32 = arith.constant 0 : i32
    return %arg0, %arg1 : i32, i32
  }
  func.func @transform_2(%arg0: i32, %arg1: i32) -> (i32, i32) {
    %c0_i32 = arith.constant 0 : i32
    return %arg0, %arg1 : i32, i32
  }
  func.func @transform_3(%arg0: i32, %arg1: i32) -> (i32, i32) {
    %c0_i32 = arith.constant 0 : i32
    return %arg0, %arg1 : i32, i32
  }
  func.func @transform_4(%arg0: i32, %arg1: i32) -> (i32, i32) {
    %c0_i32 = arith.constant 0 : i32
    return %arg0, %arg1 : i32, i32
  }
  func.func @transform_5(%arg0: i32, %arg1: i32) -> (i32, i32) {
    %c0_i32 = arith.constant 0 : i32
    return %arg0, %arg1 : i32, i32
  }
}

module attributes {stable_mosaic.version = 11 : i64} {
  func.func @_conv_stats_kernel(%arg0: i32, %arg1: memref<8x72xbf16, #tpu.memory_space<vmem>>, %arg2: memref<8x1xf32, #tpu.memory_space<vmem>>, %arg3: memref<72x512xbf16, #tpu.memory_space<vmem>>, %arg4: memref<8x512xf32, #tpu.memory_space<vmem>>, %arg5: memref<1x8x2xf32, #tpu.memory_space<vmem>>) attributes {dimension_semantics = [#tpu.dimension_semantics<parallel>], iteration_bounds = array<i64: 1>, scalar_prefetch = 0 : i64, scratch_operands = 0 : i64, tpu.core_type = #tpu.core_type<tc>, window_params = [{pipeline_mode = #tpu.pipeline_mode<synchronous>, transform_indices = @transform_0, window_bounds = array<i64: 8, 72>}, {pipeline_mode = #tpu.pipeline_mode<synchronous>, transform_indices = @transform_1, window_bounds = array<i64: 8, 1>}, {transform_indices = @transform_2, window_bounds = array<i64: 72, 512>}, {transform_indices = @transform_3, window_bounds = array<i64: 8, 512>}, {transform_indices = @transform_4, window_bounds = array<i64: 1, 8, 2>}]} {
    %c0 = arith.constant 0 : index
    %c0_0 = arith.constant 0 : index
    %0 = vector.load %arg1[%c0, %c0_0] : memref<8x72xbf16, #tpu.memory_space<vmem>>, vector<8x72xbf16>
    %c0_1 = arith.constant 0 : index
    %c0_2 = arith.constant 0 : index
    %1 = vector.load %arg3[%c0_1, %c0_2] : memref<72x512xbf16, #tpu.memory_space<vmem>>, vector<72x512xbf16>
    %cst = arith.constant dense<0.000000e+00> : vector<8x512xf32>
    %2 = tpu.matmul %0, %1, %cst {dimension_numbers = #tpu.dot_dimension_numbers<[1], [0], [0], [1], [0, 0, 1, 1], [], []>} : vector<8x72xbf16>, vector<72x512xbf16>, vector<8x512xf32> -> vector<8x512xf32>
    %c0_3 = arith.constant 0 : index
    %c0_4 = arith.constant 0 : index
    %3 = vector.load %arg2[%c0_3, %c0_4] : memref<8x1xf32, #tpu.memory_space<vmem>>, vector<8x1xf32>
    %4 = vector.broadcast %3 : vector<8x1xf32> to vector<8x512xf32>
    %5 = arith.addf %2, %4 : vector<8x512xf32>
    %c0_5 = arith.constant 0 : index
    %c0_6 = arith.constant 0 : index
    %6 = vector.load %arg4[%c0_5, %c0_6] : memref<8x512xf32, #tpu.memory_space<vmem>>, vector<8x512xf32>
    tpu.vector_store %arg4[%c0_5, %c0_6], %5 {strides = array<i32>} : memref<8x512xf32, #tpu.memory_space<vmem>>, vector<8x512xf32>,
    %cst_7 = arith.constant dense<0.000000e+00> : vector<8xf32>
    %7 = vector.multi_reduction <add>, %5, %cst_7 [1] : vector<8x512xf32> to vector<8xf32>
    %8 = vector.shape_cast %7 : vector<8xf32> to vector<8x1xf32>
    %c0_8 = arith.constant 0 : index
    %c0_9 = arith.constant 0 : index
    %c0_10 = arith.constant 0 : index
    %9 = vector.load %arg5[%c0_8, %c0_9, %c0_10] : memref<1x8x2xf32, #tpu.memory_space<vmem>>, vector<1x8x1xf32>
    %10 = vector.shape_cast %9 : vector<1x8x1xf32> to vector<8x1xf32>
    %11 = vector.shape_cast %8 : vector<8x1xf32> to vector<1x8x1xf32>
    tpu.vector_store %arg5[%c0_8, %c0_9, %c0_10], %11 {strides = array<i32>} : memref<1x8x2xf32, #tpu.memory_space<vmem>>, vector<1x8x1xf32>,
    %12 = arith.mulf %5, %5 : vector<8x512xf32>
    %cst_11 = arith.constant dense<0.000000e+00> : vector<8xf32>
    %13 = vector.multi_reduction <add>, %12, %cst_11 [1] : vector<8x512xf32> to vector<8xf32>
    %14 = vector.shape_cast %13 : vector<8xf32> to vector<8x1xf32>
    %c0_12 = arith.constant 0 : index
    %c0_13 = arith.constant 0 : index
    %c1 = arith.constant 1 : index
    %15 = vector.load %arg5[%c0_12, %c0_13, %c1] : memref<1x8x2xf32, #tpu.memory_space<vmem>>, vector<1x8x1xf32>
    %16 = vector.shape_cast %15 : vector<1x8x1xf32> to vector<8x1xf32>
    %17 = vector.shape_cast %14 : vector<8x1xf32> to vector<1x8x1xf32>
    tpu.vector_store %arg5[%c0_12, %c0_13, %c1], %17 {strides = array<i32>} : memref<1x8x2xf32, #tpu.memory_space<vmem>>, vector<1x8x1xf32>,
    return
  }
  func.func @transform_0(%arg0: i32) -> (i32, i32) {
    %c0_i32 = arith.constant 0 : i32
    %c0_i32_0 = arith.constant 0 : i32
    %c0_i32_1 = arith.constant 0 : i32
    return %c0_i32, %c0_i32_0 : i32, i32
  }
  func.func @transform_1(%arg0: i32) -> (i32, i32) {
    %c0_i32 = arith.constant 0 : i32
    %c0_i32_0 = arith.constant 0 : i32
    %c0_i32_1 = arith.constant 0 : i32
    return %c0_i32, %c0_i32_0 : i32, i32
  }
  func.func @transform_2(%arg0: i32) -> (i32, i32) {
    %c0_i32 = arith.constant 0 : i32
    %c0_i32_0 = arith.constant 0 : i32
    return %c0_i32, %arg0 : i32, i32
  }
  func.func @transform_3(%arg0: i32) -> (i32, i32) {
    %c0_i32 = arith.constant 0 : i32
    %c0_i32_0 = arith.constant 0 : i32
    return %c0_i32, %arg0 : i32, i32
  }
  func.func @transform_4(%arg0: i32) -> (i32, i32, i32) {
    %c0_i32 = arith.constant 0 : i32
    %c0_i32_0 = arith.constant 0 : i32
    %c0_i32_1 = arith.constant 0 : i32
    return %arg0, %c0_i32, %c0_i32_0 : i32, i32, i32
  }
}

module attributes {stable_mosaic.version = 11 : i64} {
  func.func @_bn_relu_kernel(%arg0: i32, %arg1: memref<8x1xf32, #tpu.memory_space<vmem>>, %arg2: memref<8x1xf32, #tpu.memory_space<vmem>>, %arg3: memref<8x512xf32, #tpu.memory_space<vmem>>, %arg4: memref<8x512xbf16, #tpu.memory_space<vmem>>) attributes {dimension_semantics = [#tpu.dimension_semantics<parallel>], iteration_bounds = array<i64: 1>, scalar_prefetch = 0 : i64, scratch_operands = 0 : i64, tpu.core_type = #tpu.core_type<tc>, window_params = [{pipeline_mode = #tpu.pipeline_mode<synchronous>, transform_indices = @transform_0, window_bounds = array<i64: 8, 1>}, {pipeline_mode = #tpu.pipeline_mode<synchronous>, transform_indices = @transform_1, window_bounds = array<i64: 8, 1>}, {transform_indices = @transform_2, window_bounds = array<i64: 8, 512>}, {transform_indices = @transform_3, window_bounds = array<i64: 8, 512>}]} {
    %c0 = arith.constant 0 : index
    %c0_0 = arith.constant 0 : index
    %0 = vector.load %arg3[%c0, %c0_0] : memref<8x512xf32, #tpu.memory_space<vmem>>, vector<8x512xf32>
    %c0_1 = arith.constant 0 : index
    %c0_2 = arith.constant 0 : index
    %1 = vector.load %arg1[%c0_1, %c0_2] : memref<8x1xf32, #tpu.memory_space<vmem>>, vector<8x1xf32>
    %2 = vector.broadcast %1 : vector<8x1xf32> to vector<8x512xf32>
    %3 = arith.mulf %0, %2 : vector<8x512xf32>
    %c0_3 = arith.constant 0 : index
    %c0_4 = arith.constant 0 : index
    %4 = vector.load %arg2[%c0_3, %c0_4] : memref<8x1xf32, #tpu.memory_space<vmem>>, vector<8x1xf32>
    %5 = vector.broadcast %4 : vector<8x1xf32> to vector<8x512xf32>
    %6 = arith.addf %3, %5 : vector<8x512xf32>
    %cst = arith.constant 0.000000e+00 : f32
    %7 = vector.broadcast %cst : f32 to vector<8x512xf32>
    %8 = arith.maximumf %6, %7 : vector<8x512xf32>
    %9 = arith.truncf %8 : vector<8x512xf32> to vector<8x512xbf16>
    %c0_5 = arith.constant 0 : index
    %c0_6 = arith.constant 0 : index
    %10 = vector.load %arg4[%c0_5, %c0_6] : memref<8x512xbf16, #tpu.memory_space<vmem>>, vector<8x512xbf16>
    tpu.vector_store %arg4[%c0_5, %c0_6], %9 {strides = array<i32>} : memref<8x512xbf16, #tpu.memory_space<vmem>>, vector<8x512xbf16>,
    return
  }
  func.func @transform_0(%arg0: i32) -> (i32, i32) {
    %c0_i32 = arith.constant 0 : i32
    %c0_i32_0 = arith.constant 0 : i32
    %c0_i32_1 = arith.constant 0 : i32
    return %c0_i32, %c0_i32_0 : i32, i32
  }
  func.func @transform_1(%arg0: i32) -> (i32, i32) {
    %c0_i32 = arith.constant 0 : i32
    %c0_i32_0 = arith.constant 0 : i32
    %c0_i32_1 = arith.constant 0 : i32
    return %c0_i32, %c0_i32_0 : i32, i32
  }
  func.func @transform_2(%arg0: i32) -> (i32, i32) {
    %c0_i32 = arith.constant 0 : i32
    %c0_i32_0 = arith.constant 0 : i32
    return %c0_i32, %arg0 : i32, i32
  }
  func.func @transform_3(%arg0: i32) -> (i32, i32) {
    %c0_i32 = arith.constant 0 : i32
    %c0_i32_0 = arith.constant 0 : i32
    return %c0_i32, %arg0 : i32, i32
  }
}

module attributes {stable_mosaic.version = 11 : i64} {
  func.func @_bn_relu_kernel(%arg0: i32, %arg1: memref<8x1xf32, #tpu.memory_space<vmem>>, %arg2: memref<8x1xf32, #tpu.memory_space<vmem>>, %arg3: memref<8x512xf32, #tpu.memory_space<vmem>>, %arg4: memref<8x512xf32, #tpu.memory_space<vmem>>) attributes {dimension_semantics = [#tpu.dimension_semantics<parallel>], iteration_bounds = array<i64: 1>, scalar_prefetch = 0 : i64, scratch_operands = 0 : i64, tpu.core_type = #tpu.core_type<tc>, window_params = [{pipeline_mode = #tpu.pipeline_mode<synchronous>, transform_indices = @transform_0, window_bounds = array<i64: 8, 1>}, {pipeline_mode = #tpu.pipeline_mode<synchronous>, transform_indices = @transform_1, window_bounds = array<i64: 8, 1>}, {transform_indices = @transform_2, window_bounds = array<i64: 8, 512>}, {transform_indices = @transform_3, window_bounds = array<i64: 8, 512>}]} {
    %c0 = arith.constant 0 : index
    %c0_0 = arith.constant 0 : index
    %0 = vector.load %arg3[%c0, %c0_0] : memref<8x512xf32, #tpu.memory_space<vmem>>, vector<8x512xf32>
    %c0_1 = arith.constant 0 : index
    %c0_2 = arith.constant 0 : index
    %1 = vector.load %arg1[%c0_1, %c0_2] : memref<8x1xf32, #tpu.memory_space<vmem>>, vector<8x1xf32>
    %2 = vector.broadcast %1 : vector<8x1xf32> to vector<8x512xf32>
    %3 = arith.mulf %0, %2 : vector<8x512xf32>
    %c0_3 = arith.constant 0 : index
    %c0_4 = arith.constant 0 : index
    %4 = vector.load %arg2[%c0_3, %c0_4] : memref<8x1xf32, #tpu.memory_space<vmem>>, vector<8x1xf32>
    %5 = vector.broadcast %4 : vector<8x1xf32> to vector<8x512xf32>
    %6 = arith.addf %3, %5 : vector<8x512xf32>
    %cst = arith.constant 0.000000e+00 : f32
    %7 = vector.broadcast %cst : f32 to vector<8x512xf32>
    %8 = arith.maximumf %6, %7 : vector<8x512xf32>
    %c0_5 = arith.constant 0 : index
    %c0_6 = arith.constant 0 : index
    %9 = vector.load %arg4[%c0_5, %c0_6] : memref<8x512xf32, #tpu.memory_space<vmem>>, vector<8x512xf32>
    tpu.vector_store %arg4[%c0_5, %c0_6], %8 {strides = array<i32>} : memref<8x512xf32, #tpu.memory_space<vmem>>, vector<8x512xf32>,
    return
  }
  func.func @transform_0(%arg0: i32) -> (i32, i32) {
    %c0_i32 = arith.constant 0 : i32
    %c0_i32_0 = arith.constant 0 : i32
    %c0_i32_1 = arith.constant 0 : i32
    return %c0_i32, %c0_i32_0 : i32, i32
  }
  func.func @transform_1(%arg0: i32) -> (i32, i32) {
    %c0_i32 = arith.constant 0 : i32
    %c0_i32_0 = arith.constant 0 : i32
    %c0_i32_1 = arith.constant 0 : i32
    return %c0_i32, %c0_i32_0 : i32, i32
  }
  func.func @transform_2(%arg0: i32) -> (i32, i32) {
    %c0_i32 = arith.constant 0 : i32
    %c0_i32_0 = arith.constant 0 : i32
    return %c0_i32, %arg0 : i32, i32
  }
  func.func @transform_3(%arg0: i32) -> (i32, i32) {
    %c0_i32 = arith.constant 0 : i32
    %c0_i32_0 = arith.constant 0 : i32
    return %c0_i32, %arg0 : i32, i32
  }
}

</mosaic_0001>

<bundles_post_ra>
// kernel: up_forward.5
= control target key start
LH: loop header
LB: loop body
LE: loop exit
PB: predicated region body
PF: predicated region fallthrough
CT: control target
= control target key end

     0   :  { %v24_v0 = vlaneseq  ;;  %s174_s0 = inlined_call_operand.vmem [shape: f32[4,256], index: 0, kind: input, shape index: {}]   ;;  %s175_s1 = inlined_call_operand.vmem [shape: f32[8,256], index: 1, kind: input, shape index: {}]   ;;  %s176_s2 = inlined_call_operand.vmem [shape: f32[8,256], index: 2, kind: input, shape index: {}]   ;;  %s177_s3 = inlined_call_operand.vmem [shape: f32[8,256], index: 3, kind: input, shape index: {}]   ;;  %s178_s4 = inlined_call_operand.vmem [shape: f32[8,256], index: 4, kind: input, shape index: {}]   ;;  %s179_s5 = inlined_call_operand.vmem [shape: f32[8,256], index: 5, kind: output, shape index: {}]  }
   0x1   :  { %v22_v1 = vld [vmem:[%s174_s0] ss:$4 sm:$0x3]  ;;  %v99_v3 = vld [vmem:[%s174_s0 + $0x1] ss:$4 sm:$0x3] }
   0x2   :  { %v25_v2 = vshrl.u32 %v24_v0, 7  ;;  %v100_v4 = vld [vmem:[%s174_s0 + $0x2] ss:$4 sm:$0x3]  ;;  %v21_v15 = vld [vmem:[%s175_s1 + $0x8] sm:$0xff] }
   0x3   :  { %v101_v5 = vld [vmem:[%s174_s0 + $0x3] ss:$4 sm:$0x3]  ;;  %v37_v16 = vld [vmem:[%s176_s2 + $0x8] sm:$0xff] }
   0x4   :  { %v26_v6 = vsub.s32 0, %v25_v2  ;;  %v30_v7 = vsub.s32 1, %v25_v2  ;;  %v20_v8 = vld [vmem:[%s175_s1] sm:$0xff]  ;;  %v56_v17 = vld [vmem:[%s177_s3 + $0x8] sm:$0xff] }
   0x5   :  { %v36_v9 = vld [vmem:[%s176_s2] sm:$0xff]  ;;  %v75_v26 = vld [vmem:[%s178_s4 + $0x8] sm:$0xff] }
   0x6   :  { %v55_v10 = vld [vmem:[%s177_s3] sm:$0xff]  ;;  %v27_v11 = vrot.slane %v22_v1, %v26_v6  ;;  %v44_v12 = vrot.slane %v99_v3, %v26_v6  ;;  %v63_v13 = vrot.slane %v100_v4, %v26_v6  ;;  %v82_v14 = vrot.slane %v101_v5, %v26_v6 }
   0x7   :  { %v74_v18 = vld [vmem:[%s178_s4] sm:$0xff]  ;;  %v31_v19 = vrot.slane %v22_v1, %v30_v7  ;;  %v48_v20 = vrot.slane %v99_v3, %v30_v7  ;;  %v67_v21 = vrot.slane %v100_v4, %v30_v7  ;;  %v86_v22 = vrot.slane %v101_v5, %v30_v7 }
   0x8   :  { %v34_v23 = vmul.f32 %v27_v11, %v20_v8  ;;  %v51_v24 = vmul.f32 %v44_v12, %v36_v9  ;;  %v70_v25 = vmul.f32 %v63_v13, %v55_v10  ;;  %v89_v31 = vmul.f32 %v82_v14, %v74_v18 }
   0x9   :  { %v35_v27 = vmul.f32 %v31_v19, %v21_v15  ;;  %v52_v28 = vmul.f32 %v48_v20, %v37_v16  ;;  %v71_v29 = vmul.f32 %v67_v21, %v56_v17  ;;  %v90_v33 = vmul.f32 %v86_v22, %v75_v26 }
   0xa   :  { %v53_v30 = vadd.f32 %v51_v24, %v34_v23 }
   0xb   :  { %v54_v32 = vadd.f32 %v52_v28, %v35_v27 }
   0xc   :  { %v72_v34 = vadd.f32 %v70_v25, %v53_v30 }
   0xd   :  { %v73_v35 = vadd.f32 %v71_v29, %v54_v32 }
   0xe   :  { %v91_v36 = vadd.f32 %v89_v31, %v72_v34 }
   0xf   :  { %v92_v37 = vadd.f32 %v90_v33, %v73_v35 }
  0x10   :  { %93 = vst [vmem:[%s179_s5] sm:$0xff] %v91_v36 }
  0x11   :  { %94 = vst [vmem:[%s179_s5 + $0x8] sm:$0xff] %v92_v37 }

// kernel: up_forward.6
= control target key start
LH: loop header
LB: loop body
LE: loop exit
PB: predicated region body
PF: predicated region fallthrough
CT: control target
= control target key end

     0   :  { %vm136_vm0 = vcmask 1043456   ;;  %v315_v2 = vmov 0   ;;  %vm132_vm1 = vcmask 588800   ;;  %vm240_vm2 = vcmask 7168   ;;  %s419_s2 = inlined_call_operand.vmem [shape: bf16[72,512], index: 2, kind: input, shape index: {}]   ;;  %s420_s1 = inlined_call_operand.vmem [shape: f32[8,1], index: 1, kind: input, shape index: {}]   ;;  %s421_s0 = inlined_call_operand.vmem [shape: bf16[8,72], index: 0, kind: input, shape index: {}]   ;;  %s422_s3 = inlined_call_operand.vmem [shape: f32[8,512], index: 3, kind: output, shape index: {0}]   ;;  %s423_s4 = inlined_call_operand.vmem [shape: f32[1,8,2], index: 4, kind: output, shape index: {1}]  }
   0x1   :  { %v34_v0 = vld [vmem:[%s419_s2 + $0x80] sm:$0xff]  ;;  %v35_v1 = vld [vmem:[%s419_s2 + $0x88] sm:$0xff]  ;;  %181 = vmatprep.mubr.bf16.mxu0 %v315_v2  ;;  %222 = vmatprep.mubr.bf16.mxu1 %v315_v2  ;;  %vm251_vm3 = vcmask 15368  }
   0x2   :  { %v278_v3 = vcombine.high %v34_v0, %v34_v0  ;;  %v280_v4 = vcombine.high %v35_v1, %v35_v1  ;;  %v277_v5 = vcombine.low %v34_v0, %v34_v0  ;;  %v279_v6 = vcombine.low %v35_v1, %v35_v1  ;;  %v291_v7 = vld [vmem:[%s419_s2 + $0x64] ss:$16 sps:$4 sm:$0xff]   ;;  %286 = vset.pattern.permute.xlu0 %v315_v2  ;;  %v293_v8 = vld [vmem:[%s419_s2 + $0x6c] ss:$16 sps:$4 sm:$0xff]   ;;  %v295_v11 = vld [vmem:[%s419_s2 + $0x60] ss:$16 sps:$4 sm:$0xff]  }
   0x3   :  { %v296_v12 = vld [vmem:[%s419_s2 + $0x68] ss:$16 sps:$4 sm:$0xff]   ;;  %v297_v13 = vld [vmem:[%s419_s2 + $0x44] ss:$16 sps:$4 sm:$0xff]   ;;  %v299_v14 = vld [vmem:[%s419_s2 + $0x4c] ss:$16 sps:$4 sm:$0xff]  }
   0x4   :  { %281 = vmatprep.subr.msk.bf16.mxu0 %vm136_vm0, %v278_v3  ;;  %283 = vmatprep.subr.msk.bf16.mxu1 %vm136_vm0, %v280_v4  ;;  %v138_v9 = vsel %vm136_vm0, %v277_v5, 0  ;;  %v144_v10 = vsel %vm136_vm0, %v279_v6, 0  ;;  %v301_v15 = vld [vmem:[%s419_s2 + $0x40] ss:$16 sps:$4 sm:$0xff]   ;;  %v302_v16 = vld [vmem:[%s419_s2 + $0x48] ss:$16 sps:$4 sm:$0xff]  }
   0x5   :  { %156 = vmatpush1.bf16.msra.mxu0 %v138_v9  ;;  %197 = vmatpush1.bf16.msra.mxu1 %v144_v10  ;;  %v303_v17 = vld [vmem:[%s419_s2 + $0x24] ss:$16 sps:$4 sm:$0xff]   ;;  %v305_v18 = vld [vmem:[%s419_s2 + $0x2c] ss:$16 sps:$4 sm:$0xff]   ;;  %v307_v20 = vld [vmem:[%s419_s2 + $0x20] ss:$16 sps:$4 sm:$0xff]  }
   0x6   :  { %157 = vmatprep.subr.bf16.mxu0 %v291_v7  ;;  %198 = vmatprep.subr.bf16.mxu1 %v293_v8  ;;  %v36_v19 = vld [vmem:[%s420_s1] sm:$0xff]  ;;  %v308_v21 = vld [vmem:[%s419_s2 + $0x28] ss:$16 sps:$4 sm:$0xff]   ;;  %v311_v23 = vld [vmem:[%s419_s2 + $0xc] ss:$16 sps:$4 sm:$0xff]  }
   0x7   :  { %v309_v22 = vld [vmem:[%s419_s2 + $0x4] ss:$16 sps:$4 sm:$0xff]   ;;  %39 = vperm.xlu0 %286, %v36_v19   ;;  %v313_v24 = vld [vmem:[%s419_s2] ss:$16 sps:$4 sm:$0xff]   ;;  %v314_v25 = vld [vmem:[%s419_s2 + $0x8] ss:$16 sps:$4 sm:$0xff]  }
   0x8   :  { %v17_v26 = vld [vmem:[%s421_s0] sm:$0xf] }
   0x9   :  { %158 = vmatpush1.bf16.msra.mxu0 %v295_v11  ;;  %199 = vmatpush1.bf16.msra.mxu1 %v296_v12 }
   0xa   :  { %159 = vmatprep.subr.bf16.mxu0 %v297_v13  ;;  %200 = vmatprep.subr.bf16.mxu1 %v299_v14 }
   0xd   :  { %160 = vmatpush1.bf16.msra.mxu0 %v301_v15  ;;  %201 = vmatpush1.bf16.msra.mxu1 %v302_v16 }
   0xe   :  { %161 = vmatprep.subr.bf16.mxu0 %v303_v17  ;;  %202 = vmatprep.subr.bf16.mxu1 %v305_v18 }
  0x11   :  { %162 = vmatpush1.bf16.msra.mxu0 %v307_v20  ;;  %203 = vmatpush1.bf16.msra.mxu1 %v308_v21 }
  0x12   :  { %163 = vmatprep.subr.bf16.mxu0 %v309_v22  ;;  %204 = vmatprep.subr.bf16.mxu1 %v311_v23 }
  0x15   :  { %164 = vmatpush1.bf16.msra.mxu0 %v313_v24  ;;  %205 = vmatpush1.bf16.msra.mxu1 %v314_v25 }
  0x18   :  { %282 = vmatmul.mubr.msk.bf16.vlgmr.msra.gmra.mxu0 %vm132_vm1, %v17_v26  ;;  %284 = vmatmul.mubr.msk.bf16.vlgmr.msra.gmra.mxu1 %vm132_vm1, %v17_v26 }
  0x82   :  { %v40_v27 = vpop.permute.xlu0 %39 }
  0xd8   :  { %v183_v28 = vpop.f32.mrf.mxu0  ;;  %v224_v29 = vpop.f32.mrf.mxu1 }
  0xd9   :  { %v184_v30 = vadd.f32 %v183_v28, %v40_v27  ;;  %v225_v31 = vadd.f32 %v224_v29, %v40_v27 }
  0xda   :  { %v185_v32 = vpop.f32.mrf.mxu0  ;;  %v226_v33 = vpop.f32.mrf.mxu1 }
  0xdb   :  { %231 = vst [vmem:[%s422_s3] sm:$0xff] %v184_v30  ;;  %233 = vst [vmem:[%s422_s3 + $0x10] sm:$0xff] %v225_v31  ;;  %v186_v34 = vadd.f32 %v185_v32, %v40_v27  ;;  %v227_v35 = vadd.f32 %v226_v33, %v40_v27  ;;  %v242_v38 = vmul.f32 %v184_v30, %v184_v30 }
  0xdc   :  { %v187_v36 = vpop.f32.mrf.mxu0  ;;  %v228_v37 = vpop.f32.mrf.mxu1  ;;  %v244_v44 = vmul.f32 %v225_v31, %v225_v31 }
  0xdd   :  { %232 = vst [vmem:[%s422_s3 + $0x8] sm:$0xff] %v186_v34  ;;  %v235_v39 = vadd.f32 %v186_v34, %v184_v30  ;;  %v243_v40 = vmul.f32 %v186_v34, %v186_v34  ;;  %234 = vst [vmem:[%s422_s3 + $0x18] sm:$0xff] %v227_v35  ;;  %v245_v47 = vmul.f32 %v227_v35, %v227_v35 }
  0xde   :  { %v188_v41 = vpop.f32.mrf.mxu0  ;;  %v229_v42 = vpop.f32.mrf.mxu1 }
  0xdf   :  { %v236_v43 = vadd.f32 %v235_v39, %v225_v31  ;;  %v246_v45 = vadd.f32 %v243_v40, %v242_v38 }
  0xe1   :  { %v237_v46 = vadd.f32 %v236_v43, %v227_v35  ;;  %v247_v48 = vadd.f32 %v246_v45, %v244_v44 }
  0xe3   :  { %238 = vadd.xlane.f32.xlu0 %v237_v46  ;;  %v248_v49 = vadd.f32 %v247_v48, %v245_v47 }
  0xe5   :  { %249 = vadd.xlane.f32.xlu1 %v248_v49 }
 0x16c   :  { %v239_v50 = vpop.xlane.xlu0 %238 }
 0x16d   :  { %241 = vst.msk [vmem:[%s423_s4] sm:$0xff] %vm240_vm2, %v239_v50 }
 0x16e   :  { %v250_v51 = vpop.xlane.xlu1 %249 }
 0x16f   :  { %252 = vst.msk [vmem:[%s423_s4] sm:$0xff] %vm251_vm3, %v250_v51 }

// kernel: up_forward.7
= control target key start
LH: loop header
LB: loop body
LE: loop exit
PB: predicated region body
PF: predicated region fallthrough
CT: control target
= control target key end

     0   :  { %v70_v0 = vmov 0   ;;  %s115_s0 = inlined_call_operand.vmem [shape: f32[8,1], index: 0, kind: input, shape index: {}]   ;;  %s116_s1 = inlined_call_operand.vmem [shape: f32[8,1], index: 1, kind: input, shape index: {}]   ;;  %s117_s2 = inlined_call_operand.vmem [shape: f32[8,512], index: 2, kind: input, shape index: {}]   ;;  %s118_s3 = inlined_call_operand.vmem [shape: bf16[8,512], index: 3, kind: output, shape index: {}]  }
   0x1   :  { %69 = vset.pattern.permute.xlu0 %v70_v0  ;;  %v18_v1 = vld [vmem:[%s115_s0] sm:$0xff]  ;;  %v15_v5 = vld [vmem:[%s117_s2 + $0x8] sm:$0xff]  ;;  %v16_v6 = vld [vmem:[%s117_s2 + $0x10] sm:$0xff] }
   0x2   :  { %21 = vperm.xlu0 %69, %v18_v1   ;;  %v28_v2 = vld [vmem:[%s116_s1] sm:$0xff]  ;;  %v17_v7 = vld [vmem:[%s117_s2 + $0x18] sm:$0xff] }
   0x3   :  { %v14_v3 = vld [vmem:[%s117_s2] sm:$0xff] }
   0x6   :  { %31 = vperm.xlu0 %69, %v28_v2  }
  0x7d   :  { %v22_v4 = vpop.permute.xlu0 %21 }
  0x7e   :  { %v24_v8 = vmul.f32 %v22_v4, %v14_v3  ;;  %v25_v9 = vmul.f32 %v22_v4, %v15_v5  ;;  %v26_v10 = vmul.f32 %v22_v4, %v16_v6  ;;  %v27_v11 = vmul.f32 %v22_v4, %v17_v7 }
  0x81   :  { %v32_v12 = vpop.permute.xlu0 %31 }
  0x82   :  { %v34_v13 = vadd.f32 %v32_v12, %v24_v8  ;;  %v35_v14 = vadd.f32 %v32_v12, %v25_v9  ;;  %v36_v15 = vadd.f32 %v32_v12, %v26_v10  ;;  %v37_v16 = vadd.f32 %v32_v12, %v27_v11 }
  0x84   :  { %v38_v17 = vmax.f32 %v34_v13, 0.0  ;;  %v39_v18 = vmax.f32 %v35_v14, 0.0  ;;  %v40_v19 = vmax.f32 %v36_v15, 0.0  ;;  %v41_v20 = vmax.f32 %v37_v16, 0.0 }
  0x86   :  { %v66_v21 = vpack.c.bf16 %v39_v18, %v38_v17  ;;  %v67_v22 = vpack.c.bf16 %v41_v20, %v40_v19 }
  0x88   :  { %58 = vst [vmem:[%s118_s3] sm:$0xff] %v66_v21  ;;  %59 = vst [vmem:[%s118_s3 + $0x8] sm:$0xff] %v67_v22 }

// kernel: up_forward.9
= control target key start
LH: loop header
LB: loop body
LE: loop exit
PB: predicated region body
PF: predicated region fallthrough
CT: control target
= control target key end

     0   :  { %v52_v0 = vmov 0   ;;  %s103_s0 = inlined_call_operand.vmem [shape: f32[8,1], index: 0, kind: input, shape index: {}]   ;;  %s104_s1 = inlined_call_operand.vmem [shape: f32[8,1], index: 1, kind: input, shape index: {}]   ;;  %s105_s2 = inlined_call_operand.vmem [shape: f32[8,512], index: 2, kind: input, shape index: {}]   ;;  %s106_s3 = inlined_call_operand.vmem [shape: f32[8,512], index: 3, kind: output, shape index: {}]  }
   0x1   :  { %51 = vset.pattern.permute.xlu0 %v52_v0  ;;  %v18_v1 = vld [vmem:[%s103_s0] sm:$0xff]  ;;  %v15_v5 = vld [vmem:[%s105_s2 + $0x8] sm:$0xff]  ;;  %v16_v6 = vld [vmem:[%s105_s2 + $0x10] sm:$0xff] }
   0x2   :  { %21 = vperm.xlu0 %51, %v18_v1   ;;  %v28_v2 = vld [vmem:[%s104_s1] sm:$0xff]  ;;  %v17_v7 = vld [vmem:[%s105_s2 + $0x18] sm:$0xff] }
   0x3   :  { %v14_v3 = vld [vmem:[%s105_s2] sm:$0xff] }
   0x6   :  { %31 = vperm.xlu0 %51, %v28_v2  }
  0x7d   :  { %v22_v4 = vpop.permute.xlu0 %21 }
  0x7e   :  { %v24_v8 = vmul.f32 %v22_v4, %v14_v3  ;;  %v25_v9 = vmul.f32 %v22_v4, %v15_v5  ;;  %v26_v10 = vmul.f32 %v22_v4, %v16_v6  ;;  %v27_v11 = vmul.f32 %v22_v4, %v17_v7 }
  0x81   :  { %v32_v12 = vpop.permute.xlu0 %31 }
  0x82   :  { %v34_v13 = vadd.f32 %v32_v12, %v24_v8  ;;  %v35_v14 = vadd.f32 %v32_v12, %v25_v9  ;;  %v36_v15 = vadd.f32 %v32_v12, %v26_v10  ;;  %v37_v16 = vadd.f32 %v32_v12, %v27_v11 }
  0x84   :  { %v38_v17 = vmax.f32 %v34_v13, 0.0  ;;  %v39_v18 = vmax.f32 %v35_v14, 0.0  ;;  %v40_v19 = vmax.f32 %v36_v15, 0.0  ;;  %v41_v20 = vmax.f32 %v37_v16, 0.0 }
  0x86   :  { %42 = vst [vmem:[%s106_s3] sm:$0xff] %v38_v17  ;;  %43 = vst [vmem:[%s106_s3 + $0x8] sm:$0xff] %v39_v18 }
  0x87   :  { %44 = vst [vmem:[%s106_s3 + $0x10] sm:$0xff] %v40_v19  ;;  %45 = vst [vmem:[%s106_s3 + $0x18] sm:$0xff] %v41_v20 }

</bundles_post_ra>
